<compile_context>
chip_gen: v6e
topology: v6e:2x2x1
jax: 0.10.0
libtpu: 0.0.40
codegen_flags: <defaults>
</compile_context>

<pallas_src>
import functools

import jax
import jax.numpy as jnp
from jax.experimental import pallas as pl
from jax.experimental.pallas import tpu as pltpu


def _vp_kernel(x_ref, m_ref, g_ref, b_ref, w_ref, cb_ref, ow_ref, ob_ref,
               o_ref, *, n_layers, kernel_size, eps):
    """One grid step: block [Bb, C, T] (NCW) -> lane-dense output block [Bb, 1, T]."""
    Bb, C, T = x_ref.shape
    K = kernel_size
    pad = K // 2
    M = Bb * T

    # NCW -> time-major [Bb*T, C] (channels on the lane axis), done in VMEM.
    x = jnp.transpose(x_ref[...].astype(jnp.float32), (0, 2, 1)).reshape(M, C)

    # Mask: [Bb, 1, T] -> row mask broadcast to [M, C], hoisted out of the layer
    # loop and built with the same transpose pattern as the input.
    m_lane = m_ref[...].astype(jnp.float32)                              # [Bb, 1, T]
    m_bcast = jnp.transpose(jnp.broadcast_to(m_lane, (Bb, C, T)),
                            (0, 2, 1)).reshape(M, C)                     # [M, C]

    zpad = jnp.zeros((Bb, pad, C), jnp.float32) if pad > 0 else None

    for l in range(n_layers):
        # --- LayerNorm over the channel (lane) dim at each time step, f32 ---
        mean = jnp.mean(x, axis=-1, keepdims=True)
        var = jnp.mean(jnp.square(x - mean), axis=-1, keepdims=True)
        xn = (x - mean) * jax.lax.rsqrt(var + eps)
        xn = xn * g_ref[l] + b_ref[l]                                    # [1, C] each

        # --- Conv1d(C, C, K, padding=K//2) as a single im2col matmul on the MXU:
        #     [M, K*C] @ [K*C, C], bf16 operands, f32 accumulation.
        xn3 = xn.reshape(Bb, T, C)
        xp = jnp.concatenate([zpad, xn3, zpad], axis=1) if pad > 0 else xn3
        xcat = jnp.concatenate([xp[:, k:k + T, :] for k in range(K)], axis=-1)
        xcat = xcat.reshape(M, K * C).astype(jnp.bfloat16)
        y = jnp.dot(xcat, w_ref[l], preferred_element_type=jnp.float32)  # [M, C] f32
        y = y + cb_ref[l]                                                # conv bias

        # --- SiLU (Dropout = identity in eval mode), then x *= x_mask ---
        y = y * jax.nn.sigmoid(y)
        x = y * m_bcast

    # --- out = Conv1d(C, 1, 1): VPU multiply + lane reduction (an MXU mat-vec with
    #     N=1 would waste 127/255 of the MXU columns); one tiny sublane->lane
    #     transpose so the store is a lane-dense [Bb, 1, T] block.
    o_col = jnp.sum(x * ow_ref[...], axis=-1, keepdims=True) + ob_ref[...]   # [M, 1]
    o_lane = jnp.transpose(o_col.reshape(Bb, T, 1), (0, 2, 1))               # [Bb, 1, T]
    o_ref[...] = (o_lane * m_lane).astype(o_ref.dtype)


def variance_predictor(x, x_mask, params, *, block_b=None):
    """x: [B, C, T] (NCW), x_mask: [B, 1, T]  ->  [B, 1, T] (PyTorch semantics)."""
    B, C, T = x.shape
    n_layers = params["ln_gamma"].shape[0]
    KC = params["conv_w"].shape[1]
    K = KC // C

    if block_b is None:
        # Pack batch rows so the matmul M-dim (block_b * T) is ~128; must divide B.
        target = max(1, 128 // max(T, 1))
        block_b = max(d for d in range(1, B + 1) if B % d == 0 and d <= target)
    assert B % block_b == 0

    kernel = functools.partial(_vp_kernel, n_layers=n_layers, kernel_size=K,
                               eps=1e-5)

    return pl.pallas_call(
        kernel,
        out_shape=jax.ShapeDtypeStruct((B, 1, T), jnp.float32),
        grid=(B // block_b,),
        in_specs=[
            pl.BlockSpec((block_b, C, T), lambda b: (b, 0, 0)),        # x (NCW)
            pl.BlockSpec((block_b, 1, T), lambda b: (b, 0, 0)),        # x_mask
            pl.BlockSpec((n_layers, 1, C), lambda b: (0, 0, 0)),       # LN gamma
            pl.BlockSpec((n_layers, 1, C), lambda b: (0, 0, 0)),       # LN beta
            pl.BlockSpec((n_layers, KC, C), lambda b: (0, 0, 0)),      # conv w (bf16, im2col)
            pl.BlockSpec((n_layers, 1, C), lambda b: (0, 0, 0)),       # conv bias
            pl.BlockSpec((1, C), lambda b: (0, 0)),                    # out w row
            pl.BlockSpec((1, 1), lambda b: (0, 0)),                    # out bias
        ],
        out_specs=pl.BlockSpec((block_b, 1, T), lambda b: (b, 0, 0)),  # lane-dense
        compiler_params=pltpu.CompilerParams(
            dimension_semantics=("parallel",),
            vmem_limit_bytes=32 * 1024 * 1024),
    )(x.astype(jnp.float32), x_mask.astype(jnp.float32),
      params["ln_gamma"], params["ln_beta"], params["conv_w"],
      params["conv_b"], params["out_w"], params["out_b"])


def init_params(key, channels, n_layers, kernel_size):
    """Deterministic synthetic parameters (PyTorch layer shapes, re-laid-out)."""
    k0, k1, k2, k3, k4, k5 = jax.random.split(key, 6)
    C, K = channels, kernel_size
    # PyTorch Conv1d weight is [C_out, C_in, K]; im2col layout is [L, K*C_in, C_out]
    # with row index = k*C + c_in. Stored in bf16 for the MXU (f32 copy kept for ref).
    conv_w_pt = 0.05 * jax.random.normal(k0, (n_layers, C, C, K), jnp.float32)
    conv_w_f32 = jnp.transpose(conv_w_pt, (0, 3, 2, 1)).reshape(n_layers, K * C, C)
    conv_b = 0.05 * jax.random.normal(k1, (n_layers, 1, C), jnp.float32)
    # out Conv1d(C, 1, 1): weight [1, C, 1] -> row [1, C]
    out_w_pt = 0.05 * jax.random.normal(k2, (1, C, 1), jnp.float32)
    out_w = out_w_pt[:, :, 0]
    out_b = 0.05 * jax.random.normal(k3, (1, 1), jnp.float32)
    ln_gamma = 1.0 + 0.1 * jax.random.normal(k4, (n_layers, 1, C), jnp.float32)
    ln_beta = 0.1 * jax.random.normal(k5, (n_layers, 1, C), jnp.float32)
    return dict(conv_w=conv_w_f32.astype(jnp.bfloat16), conv_w_f32=conv_w_f32,
                conv_b=conv_b, out_w=out_w, out_b=out_b,
                ln_gamma=ln_gamma, ln_beta=ln_beta)


def reference(x, x_mask, params):
    """Pure-JAX f32 reference of the PyTorch forward (eval mode)."""
    B, C, T = x.shape
    w = params["conv_w_f32"]                      # [L, K*C, C] f32
    L = w.shape[0]
    K = w.shape[1] // C
    pad = K // 2
    wk = w.reshape(L, K, C, C)                    # [L, K, Cin, Cout]
    h = jnp.transpose(x, (0, 2, 1)).astype(jnp.float32)        # [B, T, C]
    m = jnp.transpose(x_mask, (0, 2, 1)).astype(jnp.float32)   # [B, T, 1]
    for l in range(L):
        mean = h.mean(-1, keepdims=True)
        var = jnp.square(h - mean).mean(-1, keepdims=True)
        hn = (h - mean) / jnp.sqrt(var + 1e-5)
        hn = hn * params["ln_gamma"][l] + params["ln_beta"][l]
        hp = jnp.pad(hn, ((0, 0), (pad, pad), (0, 0)))
        acc = jnp.zeros_like(h)
        for k in range(K):
            acc = acc + hp[:, k:k + T, :] @ wk[l, k]
        y = acc + params["conv_b"][l]
        y = y * jax.nn.sigmoid(y)
        h = y * m
    out = (h * params["out_w"]).sum(-1, keepdims=True) + params["out_b"]
    out = out * m
    return jnp.transpose(out, (0, 2, 1))          # [B, 1, T]


if __name__ == "__main__":
    B, C, T = 2, 32, 16
    n_layers, kernel_size, dropout = 2, 3, 0.1    # dropout unused (eval mode)

    key = jax.random.PRNGKey(0)
    kx, kp = jax.random.split(key)
    x = jax.random.normal(kx, (B, C, T), jnp.float32)
    lengths = jnp.array([T, 10], jnp.int32)
    x_mask = (jnp.arange(T)[None, None, :] < lengths[:, None, None]).astype(jnp.float32)

    params = init_params(kp, C, n_layers, kernel_size)

    out = jax.block_until_ready(variance_predictor(x, x_mask, params))
    ref = jax.block_until_ready(reference(x, x_mask, params))

    assert out.shape == (B, 1, T), out.shape
    # Tolerance accounts for bf16 MXU operands (f32 accumulation) in the conv matmuls.
    assert jnp.allclose(out, ref, atol=2e-2, rtol=2e-2), "mismatch vs f32 reference"

    print("KERNEL_OK")
</pallas_src>

<mosaic_0001>
module attributes {stable_mosaic.version = 11 : i64} {
  func.func @_vp_kernel(%arg0: i32, %arg1: memref<2x32x16xf32, #tpu.memory_space<vmem>>, %arg2: memref<2x1x16xf32, #tpu.memory_space<vmem>>, %arg3: memref<2x1x32xf32, #tpu.memory_space<vmem>>, %arg4: memref<2x1x32xf32, #tpu.memory_space<vmem>>, %arg5: memref<2x96x32xbf16, #tpu.memory_space<vmem>>, %arg6: memref<2x1x32xf32, #tpu.memory_space<vmem>>, %arg7: memref<1x32xf32, #tpu.memory_space<vmem>>, %arg8: memref<1x1xf32, #tpu.memory_space<vmem>>, %arg9: memref<2x1x16xf32, #tpu.memory_space<vmem>>) attributes {dimension_semantics = [#tpu.dimension_semantics<parallel>], iteration_bounds = array<i64: 1>, scalar_prefetch = 0 : i64, scratch_operands = 0 : i64, tpu.core_type = #tpu.core_type<tc>, window_params = [{transform_indices = @transform_0, window_bounds = array<i64: 2, 32, 16>}, {transform_indices = @transform_1, window_bounds = array<i64: 2, 1, 16>}, {pipeline_mode = #tpu.pipeline_mode<synchronous>, transform_indices = @transform_2, window_bounds = array<i64: 2, 1, 32>}, {pipeline_mode = #tpu.pipeline_mode<synchronous>, transform_indices = @transform_3, window_bounds = array<i64: 2, 1, 32>}, {pipeline_mode = #tpu.pipeline_mode<synchronous>, transform_indices = @transform_4, window_bounds = array<i64: 2, 96, 32>}, {pipeline_mode = #tpu.pipeline_mode<synchronous>, transform_indices = @transform_5, window_bounds = array<i64: 2, 1, 32>}, {pipeline_mode = #tpu.pipeline_mode<synchronous>, transform_indices = @transform_6, window_bounds = array<i64: 1, 32>}, {pipeline_mode = #tpu.pipeline_mode<synchronous>, transform_indices = @transform_7, window_bounds = array<i64: 1, 1>}, {transform_indices = @transform_8, window_bounds = array<i64: 2, 1, 16>}]} {
    %c0 = arith.constant 0 : index
    %c0_0 = arith.constant 0 : index
    %c0_1 = arith.constant 0 : index
    %0 = vector.load %arg1[%c0, %c0_0, %c0_1] : memref<2x32x16xf32, #tpu.memory_space<vmem>>, vector<2x32x16xf32>
    %1 = tpu.transpose %0, [0, 2, 1] : vector<2x32x16xf32> -> vector<2x16x32xf32>
    %2 = vector.shape_cast %1 : vector<2x16x32xf32> to vector<32x32xf32>
    %c0_2 = arith.constant 0 : index
    %c0_3 = arith.constant 0 : index
    %c0_4 = arith.constant 0 : index
    %3 = vector.load %arg2[%c0_2, %c0_3, %c0_4] : memref<2x1x16xf32, #tpu.memory_space<vmem>>, vector<2x1x16xf32>
    %4 = vector.shape_cast %3 : vector<2x1x16xf32> to vector<2x1x16xf32>
    %5 = vector.broadcast %4 : vector<2x1x16xf32> to vector<2x32x16xf32>
    %6 = tpu.transpose %5, [0, 2, 1] : vector<2x32x16xf32> -> vector<2x16x32xf32>
    %7 = vector.shape_cast %6 : vector<2x16x32xf32> to vector<32x32xf32>
    %cst = arith.constant 0.000000e+00 : f32
    %8 = vector.broadcast %cst : f32 to vector<2x1x32xf32>
    %cst_5 = arith.constant dense<0.000000e+00> : vector<32xf32>
    %9 = vector.multi_reduction <add>, %2, %cst_5 [1] : vector<32x32xf32> to vector<32xf32>
    %10 = vector.shape_cast %9 : vector<32xf32> to vector<32x1xf32>
    %cst_6 = arith.constant 3.200000e+01 : f32
    %11 = vector.broadcast %cst_6 : f32 to vector<32x1xf32>
    %12 = arith.divf %10, %11 : vector<32x1xf32>
    %13 = vector.broadcast %12 : vector<32x1xf32> to vector<32x32xf32>
    %14 = arith.subf %2, %13 : vector<32x32xf32>
    %15 = arith.mulf %14, %14 : vector<32x32xf32>
    %cst_7 = arith.constant dense<0.000000e+00> : vector<32xf32>
    %16 = vector.multi_reduction <add>, %15, %cst_7 [1] : vector<32x32xf32> to vector<32xf32>
    %17 = vector.shape_cast %16 : vector<32xf32> to vector<32x1xf32>
    %cst_8 = arith.constant 3.200000e+01 : f32
    %18 = vector.broadcast %cst_8 : f32 to vector<32x1xf32>
    %19 = arith.divf %17, %18 : vector<32x1xf32>
    %20 = vector.broadcast %12 : vector<32x1xf32> to vector<32x32xf32>
    %21 = arith.subf %2, %20 : vector<32x32xf32>
    %cst_9 = arith.constant 9.99999974E-6 : f32
    %22 = vector.broadcast %cst_9 : f32 to vector<32x1xf32>
    %23 = arith.addf %19, %22 : vector<32x1xf32>
    %24 = math.rsqrt %23 : vector<32x1xf32>
    %25 = vector.broadcast %24 : vector<32x1xf32> to vector<32x32xf32>
    %26 = arith.mulf %21, %25 : vector<32x32xf32>
    %c0_10 = arith.constant 0 : index
    %c0_11 = arith.constant 0 : index
    %c0_12 = arith.constant 0 : index
    %27 = vector.load %arg3[%c0_10, %c0_11, %c0_12] : memref<2x1x32xf32, #tpu.memory_space<vmem>>, vector<1x1x32xf32>
    %28 = vector.shape_cast %27 : vector<1x1x32xf32> to vector<1x32xf32>
    %29 = vector.broadcast %28 : vector<1x32xf32> to vector<32x32xf32>
    %30 = arith.mulf %26, %29 : vector<32x32xf32>
    %c0_13 = arith.constant 0 : index
    %c0_14 = arith.constant 0 : index
    %c0_15 = arith.constant 0 : index
    %31 = vector.load %arg4[%c0_13, %c0_14, %c0_15] : memref<2x1x32xf32, #tpu.memory_space<vmem>>, vector<1x1x32xf32>
    %32 = vector.shape_cast %31 : vector<1x1x32xf32> to vector<1x32xf32>
    %33 = vector.broadcast %32 : vector<1x32xf32> to vector<32x32xf32>
    %34 = arith.addf %30, %33 : vector<32x32xf32>
    %35 = vector.shape_cast %34 : vector<32x32xf32> to vector<2x16x32xf32>
    %36 = tpu.concatenate %8, %35, %8 in 1 : vector<2x1x32xf32>, vector<2x16x32xf32>, vector<2x1x32xf32> -> vector<2x18x32xf32>
    %37 = vector.extract_strided_slice %36 {offsets = [0, 0, 0], sizes = [2, 16, 32], strides = [1, 1, 1]} : vector<2x18x32xf32> to vector<2x16x32xf32>
    %38 = vector.extract_strided_slice %36 {offsets = [0, 1, 0], sizes = [2, 16, 32], strides = [1, 1, 1]} : vector<2x18x32xf32> to vector<2x16x32xf32>
    %39 = vector.extract_strided_slice %36 {offsets = [0, 2, 0], sizes = [2, 16, 32], strides = [1, 1, 1]} : vector<2x18x32xf32> to vector<2x16x32xf32>
    %40 = tpu.concatenate %37, %38, %39 in 2 : vector<2x16x32xf32>, vector<2x16x32xf32>, vector<2x16x32xf32> -> vector<2x16x96xf32>
    %41 = vector.shape_cast %40 : vector<2x16x96xf32> to vector<32x96xf32>
    %42 = arith.truncf %41 : vector<32x96xf32> to vector<32x96xbf16>
    %c0_16 = arith.constant 0 : index
    %c0_17 = arith.constant 0 : index
    %c0_18 = arith.constant 0 : index
    %43 = vector.load %arg5[%c0_16, %c0_17, %c0_18] : memref<2x96x32xbf16, #tpu.memory_space<vmem>>, vector<1x96x32xbf16>
    %44 = vector.shape_cast %43 : vector<1x96x32xbf16> to vector<96x32xbf16>
    %cst_19 = arith.constant dense<0.000000e+00> : vector<32x32xf32>
    %45 = tpu.matmul %42, %44, %cst_19 {dimension_numbers = #tpu.dot_dimension_numbers<[1], [0], [0], [1], [0, 0, 1, 1], [], []>} : vector<32x96xbf16>, vector<96x32xbf16>, vector<32x32xf32> -> vector<32x32xf32>
    %c0_20 = arith.constant 0 : index
    %c0_21 = arith.constant 0 : index
    %c0_22 = arith.constant 0 : index
    %46 = vector.load %arg6[%c0_20, %c0_21, %c0_22] : memref<2x1x32xf32, #tpu.memory_space<vmem>>, vector<1x1x32xf32>
    %47 = vector.shape_cast %46 : vector<1x1x32xf32> to vector<1x32xf32>
    %48 = vector.broadcast %47 : vector<1x32xf32> to vector<32x32xf32>
    %49 = arith.addf %45, %48 : vector<32x32xf32>
    %50 = arith.negf %49 : vector<32x32xf32>
    %51 = math.exp %50 : vector<32x32xf32>
    %cst_23 = arith.constant 1.000000e+00 : f32
    %52 = vector.broadcast %cst_23 : f32 to vector<32x32xf32>
    %53 = arith.addf %52, %51 : vector<32x32xf32>
    %54 = arith.divf %52, %53 : vector<32x32xf32>
    %55 = arith.mulf %49, %54 : vector<32x32xf32>
    %56 = arith.mulf %55, %7 : vector<32x32xf32>
    %cst_24 = arith.constant dense<0.000000e+00> : vector<32xf32>
    %57 = vector.multi_reduction <add>, %56, %cst_24 [1] : vector<32x32xf32> to vector<32xf32>
    %58 = vector.shape_cast %57 : vector<32xf32> to vector<32x1xf32>
    %cst_25 = arith.constant 3.200000e+01 : f32
    %59 = vector.broadcast %cst_25 : f32 to vector<32x1xf32>
    %60 = arith.divf %58, %59 : vector<32x1xf32>
    %61 = vector.broadcast %60 : vector<32x1xf32> to vector<32x32xf32>
    %62 = arith.subf %56, %61 : vector<32x32xf32>
    %63 = arith.mulf %62, %62 : vector<32x32xf32>
    %cst_26 = arith.constant dense<0.000000e+00> : vector<32xf32>
    %64 = vector.multi_reduction <add>, %63, %cst_26 [1] : vector<32x32xf32> to vector<32xf32>
    %65 = vector.shape_cast %64 : vector<32xf32> to vector<32x1xf32>
    %cst_27 = arith.constant 3.200000e+01 : f32
    %66 = vector.broadcast %cst_27 : f32 to vector<32x1xf32>
    %67 = arith.divf %65, %66 : vector<32x1xf32>
    %68 = vector.broadcast %60 : vector<32x1xf32> to vector<32x32xf32>
    %69 = arith.subf %56, %68 : vector<32x32xf32>
    %cst_28 = arith.constant 9.99999974E-6 : f32
    %70 = vector.broadcast %cst_28 : f32 to vector<32x1xf32>
    %71 = arith.addf %67, %70 : vector<32x1xf32>
    %72 = math.rsqrt %71 : vector<32x1xf32>
    %73 = vector.broadcast %72 : vector<32x1xf32> to vector<32x32xf32>
    %74 = arith.mulf %69, %73 : vector<32x32xf32>
    %c1 = arith.constant 1 : index
    %c0_29 = arith.constant 0 : index
    %c0_30 = arith.constant 0 : index
    %75 = vector.load %arg3[%c1, %c0_29, %c0_30] : memref<2x1x32xf32, #tpu.memory_space<vmem>>, vector<1x1x32xf32>
    %76 = vector.shape_cast %75 : vector<1x1x32xf32> to vector<1x32xf32>
    %77 = vector.broadcast %76 : vector<1x32xf32> to vector<32x32xf32>
    %78 = arith.mulf %74, %77 : vector<32x32xf32>
    %c1_31 = arith.constant 1 : index
    %c0_32 = arith.constant 0 : index
    %c0_33 = arith.constant 0 : index
    %79 = vector.load %arg4[%c1_31, %c0_32, %c0_33] : memref<2x1x32xf32, #tpu.memory_space<vmem>>, vector<1x1x32xf32>
    %80 = vector.shape_cast %79 : vector<1x1x32xf32> to vector<1x32xf32>
    %81 = vector.broadcast %80 : vector<1x32xf32> to vector<32x32xf32>
    %82 = arith.addf %78, %81 : vector<32x32xf32>
    %83 = vector.shape_cast %82 : vector<32x32xf32> to vector<2x16x32xf32>
    %84 = tpu.concatenate %8, %83, %8 in 1 : vector<2x1x32xf32>, vector<2x16x32xf32>, vector<2x1x32xf32> -> vector<2x18x32xf32>
    %85 = vector.extract_strided_slice %84 {offsets = [0, 0, 0], sizes = [2, 16, 32], strides = [1, 1, 1]} : vector<2x18x32xf32> to vector<2x16x32xf32>
    %86 = vector.extract_strided_slice %84 {offsets = [0, 1, 0], sizes = [2, 16, 32], strides = [1, 1, 1]} : vector<2x18x32xf32> to vector<2x16x32xf32>
    %87 = vector.extract_strided_slice %84 {offsets = [0, 2, 0], sizes = [2, 16, 32], strides = [1, 1, 1]} : vector<2x18x32xf32> to vector<2x16x32xf32>
    %88 = tpu.concatenate %85, %86, %87 in 2 : vector<2x16x32xf32>, vector<2x16x32xf32>, vector<2x16x32xf32> -> vector<2x16x96xf32>
    %89 = vector.shape_cast %88 : vector<2x16x96xf32> to vector<32x96xf32>
    %90 = arith.truncf %89 : vector<32x96xf32> to vector<32x96xbf16>
    %c1_34 = arith.constant 1 : index
    %c0_35 = arith.constant 0 : index
    %c0_36 = arith.constant 0 : index
    %91 = vector.load %arg5[%c1_34, %c0_35, %c0_36] : memref<2x96x32xbf16, #tpu.memory_space<vmem>>, vector<1x96x32xbf16>
    %92 = vector.shape_cast %91 : vector<1x96x32xbf16> to vector<96x32xbf16>
    %cst_37 = arith.constant dense<0.000000e+00> : vector<32x32xf32>
    %93 = tpu.matmul %90, %92, %cst_37 {dimension_numbers = #tpu.dot_dimension_numbers<[1], [0], [0], [1], [0, 0, 1, 1], [], []>} : vector<32x96xbf16>, vector<96x32xbf16>, vector<32x32xf32> -> vector<32x32xf32>
    %c1_38 = arith.constant 1 : index
    %c0_39 = arith.constant 0 : index
    %c0_40 = arith.constant 0 : index
    %94 = vector.load %arg6[%c1_38, %c0_39, %c0_40] : memref<2x1x32xf32, #tpu.memory_space<vmem>>, vector<1x1x32xf32>
    %95 = vector.shape_cast %94 : vector<1x1x32xf32> to vector<1x32xf32>
    %96 = vector.broadcast %95 : vector<1x32xf32> to vector<32x32xf32>
    %97 = arith.addf %93, %96 : vector<32x32xf32>
    %98 = arith.negf %97 : vector<32x32xf32>
    %99 = math.exp %98 : vector<32x32xf32>
    %cst_41 = arith.constant 1.000000e+00 : f32
    %100 = vector.broadcast %cst_41 : f32 to vector<32x32xf32>
    %101 = arith.addf %100, %99 : vector<32x32xf32>
    %102 = arith.divf %100, %101 : vector<32x32xf32>
    %103 = arith.mulf %97, %102 : vector<32x32xf32>
    %104 = arith.mulf %103, %7 : vector<32x32xf32>
    %c0_42 = arith.constant 0 : index
    %c0_43 = arith.constant 0 : index
    %105 = vector.load %arg7[%c0_42, %c0_43] : memref<1x32xf32, #tpu.memory_space<vmem>>, vector<1x32xf32>
    %106 = vector.broadcast %105 : vector<1x32xf32> to vector<32x32xf32>
    %107 = arith.mulf %104, %106 : vector<32x32xf32>
    %cst_44 = arith.constant dense<0.000000e+00> : vector<32xf32>
    %108 = vector.multi_reduction <add>, %107, %cst_44 [1] : vector<32x32xf32> to vector<32xf32>
    %109 = vector.shape_cast %108 : vector<32xf32> to vector<32x1xf32>
    %c0_45 = arith.constant 0 : index
    %c0_46 = arith.constant 0 : index
    %110 = vector.load %arg8[%c0_45, %c0_46] : memref<1x1xf32, #tpu.memory_space<vmem>>, vector<1x1xf32>
    %111 = vector.broadcast %110 : vector<1x1xf32> to vector<32x1xf32>
    %112 = arith.addf %109, %111 : vector<32x1xf32>
    %113 = vector.shape_cast %112 : vector<32x1xf32> to vector<2x16x1xf32>
    %114 = tpu.transpose %113, [0, 2, 1] : vector<2x16x1xf32> -> vector<2x1x16xf32>
    %115 = arith.mulf %114, %3 : vector<2x1x16xf32>
    %c0_47 = arith.constant 0 : index
    %c0_48 = arith.constant 0 : index
    %c0_49 = arith.constant 0 : index
    %116 = vector.load %arg9[%c0_47, %c0_48, %c0_49] : memref<2x1x16xf32, #tpu.memory_space<vmem>>, vector<2x1x16xf32>
    tpu.vector_store %arg9[%c0_47, %c0_48, %c0_49], %115 {strides = array<i32>} : memref<2x1x16xf32, #tpu.memory_space<vmem>>, vector<2x1x16xf32>,
    return
  }
  func.func @transform_0(%arg0: i32) -> (i32, i32, i32) {
    %c0_i32 = arith.constant 0 : i32
    %c0_i32_0 = arith.constant 0 : i32
    %c0_i32_1 = arith.constant 0 : i32
    return %arg0, %c0_i32, %c0_i32_0 : i32, i32, i32
  }
  func.func @transform_1(%arg0: i32) -> (i32, i32, i32) {
    %c0_i32 = arith.constant 0 : i32
    %c0_i32_0 = arith.constant 0 : i32
    %c0_i32_1 = arith.constant 0 : i32
    return %arg0, %c0_i32, %c0_i32_0 : i32, i32, i32
  }
  func.func @transform_2(%arg0: i32) -> (i32, i32, i32) {
    %c0_i32 = arith.constant 0 : i32
    %c0_i32_0 = arith.constant 0 : i32
    %c0_i32_1 = arith.constant 0 : i32
    %c0_i32_2 = arith.constant 0 : i32
    return %c0_i32, %c0_i32_0, %c0_i32_1 : i32, i32, i32
  }
  func.func @transform_3(%arg0: i32) -> (i32, i32, i32) {
    %c0_i32 = arith.constant 0 : i32
    %c0_i32_0 = arith.constant 0 : i32
    %c0_i32_1 = arith.constant 0 : i32
    %c0_i32_2 = arith.constant 0 : i32
    return %c0_i32, %c0_i32_0, %c0_i32_1 : i32, i32, i32
  }
  func.func @transform_4(%arg0: i32) -> (i32, i32, i32) {
    %c0_i32 = arith.constant 0 : i32
    %c0_i32_0 = arith.constant 0 : i32
    %c0_i32_1 = arith.constant 0 : i32
    %c0_i32_2 = arith.constant 0 : i32
    return %c0_i32, %c0_i32_0, %c0_i32_1 : i32, i32, i32
  }
  func.func @transform_5(%arg0: i32) -> (i32, i32, i32) {
    %c0_i32 = arith.constant 0 : i32
    %c0_i32_0 = arith.constant 0 : i32
    %c0_i32_1 = arith.constant 0 : i32
    %c0_i32_2 = arith.constant 0 : i32
    return %c0_i32, %c0_i32_0, %c0_i32_1 : i32, i32, i32
  }
  func.func @transform_6(%arg0: i32) -> (i32, i32) {
    %c0_i32 = arith.constant 0 : i32
    %c0_i32_0 = arith.constant 0 : i32
    %c0_i32_1 = arith.constant 0 : i32
    return %c0_i32, %c0_i32_0 : i32, i32
  }
  func.func @transform_7(%arg0: i32) -> (i32, i32) {
    %c0_i32 = arith.constant 0 : i32
    %c0_i32_0 = arith.constant 0 : i32
    %c0_i32_1 = arith.constant 0 : i32
    return %c0_i32, %c0_i32_0 : i32, i32
  }
  func.func @transform_8(%arg0: i32) -> (i32, i32, i32) {
    %c0_i32 = arith.constant 0 : i32
    %c0_i32_0 = arith.constant 0 : i32
    %c0_i32_1 = arith.constant 0 : i32
    return %arg0, %c0_i32, %c0_i32_0 : i32, i32, i32
  }
}

</mosaic_0001>

<bundles_post_ra>
// kernel: tpu_custom_call.1
= control target key start
LH: loop header
LB: loop body
LE: loop exit
PB: predicated region body
PF: predicated region fallthrough
CT: control target
= control target key end

     0   :  { %s1382_s0 = inlined_call_operand.vmem [shape: f32[2,32,16], index: 0, kind: input, shape index: {}]   ;;  %s1383_s1 = inlined_call_operand.vmem [shape: f32[2,1,16], index: 1, kind: input, shape index: {}]   ;;  %s1384_s2 = inlined_call_operand.vmem [shape: f32[2,1,32], index: 2, kind: input, shape index: {}]   ;;  %s1385_s3 = inlined_call_operand.vmem [shape: f32[2,1,32], index: 3, kind: input, shape index: {}]   ;;  %s1386_s4 = inlined_call_operand.vmem [shape: bf16[2,96,32], index: 4, kind: input, shape index: {}]   ;;  %s1387_s5 = inlined_call_operand.vmem [shape: f32[2,1,32], index: 5, kind: input, shape index: {}]   ;;  %s1388_s6 = inlined_call_operand.vmem [shape: f32[1,32], index: 6, kind: input, shape index: {}]   ;;  %s1389_s7 = inlined_call_operand.<no memory space> [shape: f32[1,1], index: 7, kind: input, shape index: {}]   ;;  %s1390_s8 = inlined_call_operand.hbm [shape: f32[2,1,16], index: 8, kind: output, shape index: {}]  }
   0x1   :  { %v13_v0 = vstv %s1389_s7 }
   0x2   :  { %14 = vst [vmem:[#allocation2] sm:$0x1] %v13_v0 }
   0x3   :  { %v37_v1 = vld [vmem:[%s1382_s0 + $0x20] sm:$0xff]  ;;  %v38_v3 = vld [vmem:[%s1382_s0 + $0x28] sm:$0xff]  ;;  %v39_v5 = vld [vmem:[%s1382_s0 + $0x30] sm:$0xff] }
   0x4   :  { %v33_v2 = vld [vmem:[%s1382_s0] sm:$0xff]  ;;  %73 = vxpose.xlu1.b32.start [1/4] (short) (narrow) %v37_v1, 16  ;;  %v34_v4 = vld [vmem:[%s1382_s0 + $0x8] sm:$0xff]  ;;  %v35_v6 = vld [vmem:[%s1382_s0 + $0x10] sm:$0xff] }
   0x5   :  { %41 = vxpose.xlu0.b32.start [1/4] (short) (narrow) %v33_v2, 16  ;;  %v40_v7 = vld [vmem:[%s1382_s0 + $0x38] sm:$0xff] }
   0x6   :  { %v36_v8 = vld [vmem:[%s1382_s0 + $0x18] sm:$0xff] }
   0x8   :  { %74 = vxpose.xlu1.b32.cont [2/4] (short) (narrow) %v38_v3, 16 }
   0x9   :  { %42 = vxpose.xlu0.b32.cont [2/4] (short) (narrow) %v34_v4, 16 }
   0xc   :  { %75 = vxpose.xlu1.b32.cont [3/4] (short) (narrow) %v39_v5, 16 }
   0xd   :  { %43 = vxpose.xlu0.b32.cont [3/4] (short) (narrow) %v35_v6, 16 }
   0xe   :  { %15 = vsyncpa [#allocation4], 0  ;;  %vm183_vm0 = vcmask 261120   ;;  %v1042_v37 = vld [vmem:[%s1386_s4 + $0x28] sm:$0xff]   ;;  %v1043_v38 = vld [vmem:[%s1386_s4 + $0x20] sm:$0xff]   ;;  %vm263_vm1 = vcmask 1040384  }
   0xf   :  { %964 = vmatprep.subr.bf16.mxu0 %v1042_v37  ;;  %v1044_v39 = vld [vmem:[%s1386_s4 + $0x18] sm:$0xff]   ;;  %v901_v53 = vld [vmem:[%s1384_s2] ss:$0 sm:$0xff]  ;;  %v1045_v62 = vld [vmem:[%s1386_s4 + $0x10] sm:$0xff]   ;;  %vm284_vm2 = vcmask 1046528   ;;  %s1124_s7 = smov 32  }
  0x10   :  { %76 = vxpose.xlu1.b32.end [4/4] (short) (narrow) %v40_v7, 16  ;;  %965 = vmatpush3.bf16.msra.mxu0 %v1042_v37  ;;  %v902_v55 = vld [vmem:[%s1385_s3] ss:$0 sm:$0xff]  ;;  %vm307_vm3 = vcmask 1045504   ;;  %s1125_s15 = smov 64   ;;  %vm334_vm4 = vcmask 523264  }
  0x11   :  { %44 = vxpose.xlu0.b32.end [4/4] (short) (narrow) %v36_v8, 16  ;;  %966 = vmatprep.subr.bf16.mxu0 %v1043_v38  ;;  %vm396_vm5 = vcmask 785408   ;;  %vm882_vm6 = vcmask 122880  }
  0x14   :  { %967 = vmatpush3.bf16.msra.mxu0 %v1043_v38 }
  0x15   :  { %968 = vmatprep.subr.bf16.mxu0 %v1044_v39 }
  0x18   :  { %969 = vmatpush3.bf16.msra.mxu0 %v1044_v39 }
  0x19   :  { %970 = vmatprep.subr.bf16.mxu0 %v1045_v62 }
  0x1c   :  { %971 = vmatpush3.bf16.msra.mxu0 %v1045_v62 }
  0x80   :  { %v89_v9 = vpop.trf.xlu1 }
  0x81   :  { %v57_v10 = vpop.trf.xlu0  ;;  %v190_v11 = vsel %vm183_vm0, %v89_v9, 0.0 }
  0x82   :  { %v184_v12 = vsel %vm183_vm0, %v57_v10, 0.0  ;;  %191 = vadd.xlane.f32.xlu1 %v190_v11 }
  0x83   :  { %185 = vadd.xlane.f32.xlu0 %v184_v12 }
  0x84   :  { %v90_v14 = vpop.trf.xlu1 }
  0x85   :  { %v58_v13 = vpop.trf.xlu0  ;;  %v193_v16 = vsel %vm183_vm0, %v90_v14, 0.0 }
  0x86   :  { %v187_v15 = vsel %vm183_vm0, %v58_v13, 0.0 }
  0x87   :  { %188 = vadd.xlane.f32.xlu1 %v187_v15 }
  0x8b   :  { %194 = vadd.xlane.f32.xlu1 %v193_v16 }
 0x10b   :  { %v192_v17 = vpop.xlane.xlu1 %191 }
 0x10c   :  { %v186_v18 = vpop.xlane.xlu0 %185  ;;  %v199_v19 = vmul.f32 0.03125, %v192_v17 }
 0x10d   :  { %v197_v20 = vmul.f32 0.03125, %v186_v18  ;;  %v1047_v18 = vld [vmem:[%s1386_s4] sm:$0xff]  }
 0x10e   :  { %v203_v21 = vsub.f32 %v89_v9, %v199_v19 }
 0x10f   :  { %v201_v22 = vsub.f32 %v57_v10, %v197_v20  ;;  %v1046_v10 = vld [vmem:[%s1386_s4 + $0x8] sm:$0xff]  }
 0x110   :  { %v189_v23 = vpop.xlane.xlu1 %188  ;;  %v207_v28 = vmul.f32 %v203_v21, %v203_v21  ;;  %972 = vmatprep.subr.bf16.mxu0 %v1046_v10 }
 0x111   :  { %v198_v24 = vmul.f32 0.03125, %v189_v23  ;;  %v205_v25 = vmul.f32 %v201_v22, %v201_v22  ;;  %973 = vmatpush3.bf16.msra.mxu0 %v1046_v10 }
 0x112   :  { %v215_v34 = vsel %vm183_vm0, %v207_v28, 0.0  ;;  %974 = vmatprep.subr.bf16.mxu0 %v1047_v18 }
 0x113   :  { %v202_v26 = vsub.f32 %v58_v13, %v198_v24  ;;  %v209_v27 = vsel %vm183_vm0, %v205_v25, 0.0 }
 0x114   :  { %v195_v29 = vpop.xlane.xlu1 %194  ;;  %210 = vadd.xlane.f32.xlu0 %v209_v27 }
 0x115   :  { %v200_v30 = vmul.f32 0.03125, %v195_v29  ;;  %v206_v31 = vmul.f32 %v202_v26, %v202_v26  ;;  %975 = vmatpush3.bf16.msra.mxu0 %v1047_v18 }
 0x117   :  { %v204_v32 = vsub.f32 %v90_v14, %v200_v30  ;;  %v212_v33 = vsel %vm183_vm0, %v206_v31, 0.0 }
 0x118   :  { %213 = vadd.xlane.f32.xlu1 %v212_v33  ;;  %216 = vadd.xlane.f32.xlu0 %v215_v34 }
 0x119   :  { %v208_v35 = vmul.f32 %v204_v32, %v204_v32 }
 0x11b   :  { %v218_v36 = vsel %vm183_vm0, %v208_v35, 0.0 }
 0x11c   :  { %219 = vadd.xlane.f32.xlu1 %v218_v36 }
 0x19d   :  { %v211_v40 = vpop.xlane.xlu0 %210 }
 0x19e   :  { %v221_v41 = vmul.f32 0.03125, %v211_v40 }
 0x1a0   :  { %v225_v42 = vadd.f32 1e-05, %v221_v41 }
 0x1a1   :  { %v214_v43 = vpop.xlane.xlu1 %213  ;;  %v217_v44 = vpop.xlane.xlu0 %216 }
 0x1a2   :  { %1054 = vrsqrt.f32 %v225_v42  ;;  %v222_v45 = vmul.f32 0.03125, %v214_v43  ;;  %v223_v46 = vmul.f32 0.03125, %v217_v44  ;;  %v109_v43 = vlaneseq }
 0x1a4   :  { %v226_v47 = vadd.f32 1e-05, %v222_v45  ;;  %v227_v48 = vadd.f32 1e-05, %v223_v46  ;;  %v110_v44 = vshrl.u32 %v109_v43, 7 }
 0x1a5   :  { %v220_v49 = vpop.xlane.xlu1 %219  ;;  %v1266_v46 = vld [vmem:[%s1383_s1 + $0x1] sm:$0x1] }
 0x1a6   :  { %1056 = vrsqrt.f32 %v226_v47  ;;  %v224_v50 = vmul.f32 0.03125, %v220_v49  ;;  %v111_v45 = vsub.s32 0, %v110_v44 }
 0x1a7   :  { %1058 = vrsqrt.f32 %v227_v48  ;;  %v1272_v48 = vld [vmem:[%s1383_s1] sm:$0x1] }
 0x1a8   :  { %v228_v51 = vadd.f32 1e-05, %v224_v50  ;;  %v116_v47 = vrot.slane %v1266_v46, %v111_v45  ;;  %v112_v49 = vrot.slane %v1272_v48, %v111_v45 }
 0x1aa   :  { %1060 = vrsqrt.f32 %v228_v51 }
 0x1af   :  { %v1055_v52 = vpop.eup %1054 }
 0x1b0   :  { %v233_v54 = vmul.f32 %v1055_v52, %v201_v22 }
 0x1b2   :  { %v244_v56 = vmul.f32 %v901_v53, %v233_v54 }
 0x1b3   :  { %v1057_v57 = vpop.eup %1056 }
 0x1b4   :  { %v1059_v58 = vpop.eup %1058  ;;  %v234_v59 = vmul.f32 %v1057_v57, %v202_v26  ;;  %v255_v60 = vadd.f32 %v902_v55, %v244_v56 }
 0x1b5   :  { %v235_v61 = vmul.f32 %v1059_v58, %v203_v21 }
 0x1b6   :  { %v245_v63 = vmul.f32 %v901_v53, %v234_v59  ;;  %v264_v0 = vrot.slane %v255_v60, 7 }
 0x1b7   :  { %v1061_v1 = vpop.eup %1060  ;;  %v246_v2 = vmul.f32 %v901_v53, %v235_v61 }
 0x1b8   :  { %v236_v3 = vmul.f32 %v1061_v1, %v204_v32  ;;  %v256_v4 = vadd.f32 %v902_v55, %v245_v63  ;;  %v1228_v7 = vsel %vm263_vm1, 0.0, %v264_v0 }
 0x1b9   :  { %v257_v5 = vadd.f32 %v902_v55, %v246_v2  ;;  %v285_v14 = vrot.slane %v1228_v7, 1  ;;  %v308_v33 = vrot.slane %v1228_v7, 2 }
 0x1ba   :  { %v265_v6 = vrot.slane %v256_v4, 7  ;;  %v247_v8 = vmul.f32 %v901_v53, %v236_v3 }
 0x1bb   :  { %v267_v9 = vrot.slane %v257_v5, 7 }
 0x1bc   :  { %v1234_v11 = vsel %vm263_vm1, %v264_v0, %v265_v6  ;;  %v278_v12 = vsel %vm263_vm1, %v265_v6, 0.0  ;;  %v258_v13 = vadd.f32 %v902_v55, %v247_v8 }
 0x1bd   :  { %v286_v15 = vrot.slane %v1234_v11, 1  ;;  %v288_v16 = vrot.slane %v278_v12, 1  ;;  %v1240_v17 = vsel %vm263_vm1, 0.0, %v267_v9  ;;  %v309_v20 = vrot.slane %v1234_v11, 2 }
 0x1be   :  { %v268_v19 = vrot.slane %v258_v13, 7  ;;  %v313_v23 = vrot.slane %v1240_v17, 2  ;;  %v290_v24 = vrot.slane %v1240_v17, 1  ;;  %v311_v28 = vrot.slane %v278_v12, 2 }
 0x1bf   :  { %v287_v21 = vsel %vm284_vm2, %v285_v14, %v286_v15  ;;  %v289_v22 = vsel %vm284_vm2, %v286_v15, %v288_v16  ;;  %v310_v40 = vsel %vm307_vm3, %v308_v33, %v309_v20 }
 0x1c0   :  { %v1002_v25 = vpack.i.bf16 %v289_v22, %v287_v21  ;;  %v269_v26 = vsel %vm263_vm1, %v267_v9, %v268_v19  ;;  %v279_v27 = vsel %vm263_vm1, %v268_v19, 0.0  ;;  %v312_v41 = vsel %vm307_vm3, %v309_v20, %v311_v28  ;;  %v903_v9 = vld [vmem:[%s1387_s5] ss:$0 sm:$0xff] }
 0x1c1   :  { %v314_v29 = vrot.slane %v269_v26, 2  ;;  %v316_v30 = vrot.slane %v279_v27, 2  ;;  %v291_v31 = vrot.slane %v269_v26, 1  ;;  %v293_v32 = vrot.slane %v279_v27, 1 }
 0x1c2   :  { %1003 = vrot.lane.b32.xlu0 %v1002_v25, %s1124_s7  ;;  %v1012_v42 = vpack.i.bf16 %v312_v41, %v310_v40 }
 0x1c3   :  { %v315_v34 = vsel %vm307_vm3, %v313_v23, %v314_v29  ;;  %v317_v35 = vsel %vm307_vm3, %v314_v29, %v316_v30  ;;  %v292_v36 = vsel %vm284_vm2, %v290_v24, %v291_v31  ;;  %v294_v37 = vsel %vm284_vm2, %v291_v31, %v293_v32 }
 0x1c4   :  { %v1017_v38 = vpack.i.bf16 %v317_v35, %v315_v34  ;;  %v1007_v39 = vpack.i.bf16 %v294_v37, %v292_v36 }
 0x1c6   :  { %1018 = vrot.lane.b32.xlu0 %v1017_v38, %s1125_s15  ;;  %1008 = vrot.lane.b32.xlu1 %v1007_v39, %s1124_s7 }
 0x1ca   :  { %1013 = vrot.lane.b32.xlu1 %v1012_v42, %s1125_s15 }
 0x1e4   :  { %151 = vxpose.xlu0.b32.start [1/4] (short) (narrow) %v116_v47, 16 }
 0x1e8   :  { %152 = vxpose.xlu0.b32.cont [2/4] (short) (narrow) %v116_v47, 16 }
 0x1ec   :  { %153 = vxpose.xlu0.b32.cont [3/4] (short) (narrow) %v116_v47, 16 }
 0x1f0   :  { %154 = vxpose.xlu0.b32.end [4/4] (short) (narrow) %v116_v47, 16 }
 0x1f3   :  { %119 = vxpose.xlu1.b32.start [1/4] (short) (narrow) %v112_v49, 16 }
 0x1f7   :  { %120 = vxpose.xlu1.b32.cont [2/4] (short) (narrow) %v112_v49, 16 }
 0x1fb   :  { %121 = vxpose.xlu1.b32.cont [3/4] (short) (narrow) %v112_v49, 16 }
 0x1ff   :  { %122 = vxpose.xlu1.b32.end [4/4] (short) (narrow) %v112_v49, 16 }
 0x234   :  { %v1004_v50 = vpop.permute.xlu0 %1003 }
 0x235   :  { %v1006_v55 = vunpack.i.h.bf16 %v1004_v50  ;;  %v1005_v56 = vunpack.i.l.bf16 %v1004_v50 }
 0x237   :  { %v330_v2 = vsel %vm183_vm0, %v1228_v7, %v1005_v56  ;;  %v331_v3 = vsel %vm183_vm0, %v1234_v11, %v1006_v55 }
 0x238   :  { %v1009_v51 = vpop.permute.xlu1 %1008  ;;  %v1019_v52 = vpop.permute.xlu0 %1018 }
 0x239   :  { %v1011_v53 = vunpack.i.h.bf16 %v1009_v51  ;;  %v1010_v54 = vunpack.i.l.bf16 %v1009_v51  ;;  %v1021_v57 = vunpack.i.h.bf16 %v1019_v52  ;;  %v1020_v58 = vunpack.i.l.bf16 %v1019_v52 }
 0x23b   :  { %v333_v59 = vsel %vm183_vm0, %v269_v26, %v1011_v53  ;;  %v332_v60 = vsel %vm183_vm0, %v1240_v17, %v1010_v54 }
 0x23c   :  { %v1014_v61 = vpop.permute.xlu1 %1013  ;;  %v338_v0 = vsel %vm334_vm4, %v333_v59, %v1021_v57  ;;  %v337_v1 = vsel %vm334_vm4, %v332_v60, %v1020_v58 }
 0x23d   :  { %v1016_v62 = vunpack.i.h.bf16 %v1014_v61  ;;  %v1015_v63 = vunpack.i.l.bf16 %v1014_v61  ;;  %v340_v8 = vpack.c.bf16 %v338_v0, %v337_v1 }
 0x23f   :  { %v335_v4 = vsel %vm334_vm4, %v330_v2, %v1015_v63  ;;  %v336_v5 = vsel %vm334_vm4, %v331_v3, %v1016_v62 }
 0x240   :  { %v339_v6 = vpack.c.bf16 %v336_v5, %v335_v4 }
 0x242   :  { %976 = vmatprep.mubr.msk.bf16.mxu0 %vm396_vm5, %v339_v6 }
 0x243   :  { %977 = vmatmul.mubr.msk.bf16.vlgmr.msra.gmra.mxu0 %vm396_vm5, %v340_v8  ;;  %v1048_v8 = vld [vmem:[%s1386_s4 + $0x58] sm:$0xff]  }
 0x244   :  { %980 = vmatprep.subr.bf16.mxu1 %v1048_v8 }
 0x245   :  { %981 = vmatpush3.bf16.msra.mxu1 %v1048_v8 }
 0x260   :  { %v1293_v32 = vpop.trf.xlu0 }
 0x264   :  { %v1300_v43 = vpop.trf.xlu0 }
 0x26f   :  { %v1291_v30 = vpop.trf.xlu1 }
 0x273   :  { %v1296_v38 = vpop.trf.xlu1 }
 0x303   :  { %v978_v10 = vpop.f32.mrf.mxu0 }
 0x304   :  { %v446_v7 = vadd.f32 %v978_v10, %v903_v9  ;;  %v1050_v10 = vld [vmem:[%s1386_s4 + $0x48] sm:$0xff]  }
 0x305   :  { %v437_v12 = vpop.f32.mrf.mxu0 }
 0x306   :  { %v914_v13 = vmul.f32 -1.442695, %v446_v7  ;;  %v438_v11 = vadd.f32 %v903_v9, %v437_v12 }
 0x307   :  { %v979_v14 = vpop.f32.mrf.mxu0 }
 0x308   :  { %1062 = vpow2.f32 %v914_v13  ;;  %v912_v15 = vmul.f32 -1.442695, %v438_v11  ;;  %v449_v16 = vadd.f32 %v979_v14, %v903_v9 }
 0x309   :  { %v440_v17 = vpop.f32.mrf.mxu0 }
 0x30a   :  { %1064 = vpow2.f32 %v912_v15  ;;  %v915_v18 = vmul.f32 -1.442695, %v449_v16  ;;  %v441_v19 = vadd.f32 %v903_v9, %v440_v17  ;;  %v1049_v9 = vld [vmem:[%s1386_s4 + $0x50] sm:$0xff]  }
 0x30b   :  { %982 = vmatprep.subr.bf16.mxu1 %v1049_v9 }
 0x30c   :  { %1066 = vpow2.f32 %v915_v18  ;;  %v913_v20 = vmul.f32 -1.442695, %v441_v19  ;;  %983 = vmatpush3.bf16.msra.mxu1 %v1049_v9 }
 0x30d   :  { %984 = vmatprep.subr.bf16.mxu1 %v1050_v10 }
 0x30e   :  { %1068 = vpow2.f32 %v913_v20 }
 0x310   :  { %985 = vmatpush3.bf16.msra.mxu1 %v1050_v10 }
 0x315   :  { %v1063_v21 = vpop.eup %1062 }
 0x316   :  { %v466_v22 = vadd.f32 1.0, %v1063_v21 }
 0x317   :  { %v1065_v23 = vpop.eup %1064 }
 0x318   :  { %1070 = vrcp.f32 %v466_v22  ;;  %v464_v24 = vadd.f32 1.0, %v1065_v23  ;;  %v917_v23 = vld [vmem:[%s1384_s2 + $0x1] ss:$0 sm:$0xff] }
 0x319   :  { %v1067_v25 = vpop.eup %1066 }
 0x31a   :  { %1072 = vrcp.f32 %v464_v24  ;;  %v467_v26 = vadd.f32 1.0, %v1067_v25  ;;  %v919_v25 = vld [vmem:[%s1385_s3 + $0x1] ss:$0 sm:$0xff] }
 0x31b   :  { %v1069_v27 = vpop.eup %1068 }
 0x31c   :  { %1074 = vrcp.f32 %v467_v26  ;;  %v465_v28 = vadd.f32 1.0, %v1069_v27 }
 0x31e   :  { %1076 = vrcp.f32 %v465_v28 }
 0x325   :  { %v1071_v29 = vpop.eup %1070 }
 0x326   :  { %v478_v33 = vmul.f32 %v1071_v29, %v446_v7 }
 0x327   :  { %v1073_v31 = vpop.eup %1072 }
 0x328   :  { %v476_v34 = vmul.f32 %v1073_v31, %v438_v11  ;;  %v482_v41 = vmul.f32 %v478_v33, %v1293_v32 }
 0x329   :  { %v1075_v35 = vpop.eup %1074 }
 0x32a   :  { %v480_v36 = vmul.f32 %v476_v34, %v1291_v30  ;;  %v479_v39 = vmul.f32 %v1075_v35, %v449_v16  ;;  %v490_v49 = vsel %vm183_vm0, %v482_v41, 0.0  ;;  %v1051_v34 = vld [vmem:[%s1386_s4 + $0x40] sm:$0xff]  }
 0x32b   :  { %v1077_v37 = vpop.eup %1076  ;;  %986 = vmatprep.subr.bf16.mxu1 %v1051_v34 }
 0x32c   :  { %v477_v40 = vmul.f32 %v1077_v37, %v441_v19  ;;  %v484_v42 = vsel %vm183_vm0, %v480_v36, 0.0  ;;  %v483_v45 = vmul.f32 %v479_v39, %v1300_v43  ;;  %987 = vmatpush3.bf16.msra.mxu1 %v1051_v34 }
 0x32d   :  { %485 = vadd.xlane.f32.xlu0 %v484_v42 }
 0x32e   :  { %v481_v44 = vmul.f32 %v477_v40, %v1296_v38  ;;  %v493_v50 = vsel %vm183_vm0, %v483_v45, 0.0 }
 0x330   :  { %v487_v47 = vsel %vm183_vm0, %v481_v44, 0.0 }
 0x331   :  { %488 = vadd.xlane.f32.xlu1 %v487_v47  ;;  %491 = vadd.xlane.f32.xlu0 %v490_v49 }
 0x335   :  { %494 = vadd.xlane.f32.xlu1 %v493_v50  ;;  %v1052_v50 = vld [vmem:[%s1386_s4 + $0x38] sm:$0xff]  }
 0x336   :  { %988 = vmatprep.subr.bf16.mxu1 %v1052_v50 }
 0x337   :  { %989 = vmatpush3.bf16.msra.mxu1 %v1052_v50 }
 0x3b6   :  { %v486_v51 = vpop.xlane.xlu0 %485 }
 0x3b7   :  { %v496_v52 = vmul.f32 0.03125, %v486_v51 }
 0x3b9   :  { %v500_v53 = vsub.f32 %v480_v36, %v496_v52 }
 0x3ba   :  { %v489_v54 = vpop.xlane.xlu1 %488  ;;  %v492_v55 = vpop.xlane.xlu0 %491 }
 0x3bb   :  { %v497_v56 = vmul.f32 0.03125, %v489_v54  ;;  %v498_v57 = vmul.f32 0.03125, %v492_v55  ;;  %v504_v58 = vmul.f32 %v500_v53, %v500_v53 }
 0x3bd   :  { %v501_v59 = vsub.f32 %v481_v44, %v497_v56  ;;  %v502_v60 = vsub.f32 %v482_v41, %v498_v57  ;;  %v508_v61 = vsel %vm183_vm0, %v504_v58, 0.0  ;;  %v1053_v58 = vld [vmem:[%s1386_s4 + $0x30] sm:$0xff]  }
 0x3be   :  { %v495_v62 = vpop.xlane.xlu1 %494  ;;  %509 = vadd.xlane.f32.xlu0 %v508_v61  ;;  %990 = vmatprep.subr.bf16.mxu1 %v1053_v58 }
 0x3bf   :  { %v499_v63 = vmul.f32 0.03125, %v495_v62  ;;  %v505_v0 = vmul.f32 %v501_v59, %v501_v59  ;;  %v506_v1 = vmul.f32 %v502_v60, %v502_v60  ;;  %991 = vmatpush3.bf16.msra.mxu1 %v1053_v58 }
 0x3c1   :  { %v503_v2 = vsub.f32 %v483_v45, %v499_v63  ;;  %v511_v3 = vsel %vm183_vm0, %v505_v0, 0.0  ;;  %v514_v4 = vsel %vm183_vm0, %v506_v1, 0.0 }
 0x3c2   :  { %512 = vadd.xlane.f32.xlu1 %v511_v3  ;;  %515 = vadd.xlane.f32.xlu0 %v514_v4 }
 0x3c3   :  { %v507_v5 = vmul.f32 %v503_v2, %v503_v2 }
 0x3c5   :  { %v517_v6 = vsel %vm183_vm0, %v507_v5, 0.0 }
 0x3c6   :  { %518 = vadd.xlane.f32.xlu1 %v517_v6 }
 0x447   :  { %v510_v7 = vpop.xlane.xlu0 %509 }
 0x448   :  { %v520_v12 = vmul.f32 0.03125, %v510_v7 }
 0x44a   :  { %v524_v13 = vadd.f32 1e-05, %v520_v12 }
 0x44b   :  { %v513_v11 = vpop.xlane.xlu1 %512  ;;  %v516_v14 = vpop.xlane.xlu0 %515 }
 0x44c   :  { %1078 = vrsqrt.f32 %v524_v13  ;;  %v521_v15 = vmul.f32 0.03125, %v513_v11  ;;  %v522_v16 = vmul.f32 0.03125, %v516_v14 }
 0x44e   :  { %v525_v17 = vadd.f32 1e-05, %v521_v15  ;;  %v526_v18 = vadd.f32 1e-05, %v522_v16 }
 0x44f   :  { %v519_v19 = vpop.xlane.xlu1 %518 }
 0x450   :  { %1080 = vrsqrt.f32 %v525_v17  ;;  %v523_v20 = vmul.f32 0.03125, %v519_v19 }
 0x451   :  { %1082 = vrsqrt.f32 %v526_v18 }
 0x452   :  { %v527_v21 = vadd.f32 1e-05, %v523_v20 }
 0x454   :  { %1084 = vrsqrt.f32 %v527_v21 }
 0x459   :  { %v1079_v22 = vpop.eup %1078 }
 0x45a   :  { %v532_v24 = vmul.f32 %v1079_v22, %v500_v53 }
 0x45c   :  { %v544_v26 = vmul.f32 %v917_v23, %v532_v24 }
 0x45d   :  { %v1081_v27 = vpop.eup %1080 }
 0x45e   :  { %v1083_v28 = vpop.eup %1082  ;;  %v533_v29 = vmul.f32 %v1081_v27, %v501_v59  ;;  %v556_v31 = vadd.f32 %v919_v25, %v544_v26 }
 0x45f   :  { %v534_v33 = vmul.f32 %v1083_v28, %v502_v60 }
 0x460   :  { %v545_v35 = vmul.f32 %v917_v23, %v533_v29  ;;  %v564_v36 = vrot.slane %v556_v31, 7 }
 0x461   :  { %v1085_v37 = vpop.eup %1084  ;;  %v546_v39 = vmul.f32 %v917_v23, %v534_v33 }
 0x462   :  { %v535_v40 = vmul.f32 %v1085_v37, %v503_v2  ;;  %v557_v41 = vadd.f32 %v919_v25, %v545_v35  ;;  %v576_v45 = vsel %vm263_vm1, 0.0, %v564_v36 }
 0x463   :  { %v558_v42 = vadd.f32 %v919_v25, %v546_v39  ;;  %v584_v54 = vrot.slane %v576_v45, 1  ;;  %v606_v10 = vrot.slane %v576_v45, 2 }
 0x464   :  { %v565_v44 = vrot.slane %v557_v41, 7  ;;  %v547_v47 = vmul.f32 %v917_v23, %v535_v40 }
 0x465   :  { %v567_v49 = vrot.slane %v558_v42, 7 }
 0x466   :  { %v566_v51 = vsel %vm263_vm1, %v564_v36, %v565_v44  ;;  %v578_v52 = vsel %vm263_vm1, %v565_v44, 0.0  ;;  %v559_v53 = vadd.f32 %v919_v25, %v547_v47  ;;  %v933_v47 = vld [vmem:[%s1387_s5 + $0x1] ss:$0 sm:$0xff] }
 0x467   :  { %v585_v55 = vrot.slane %v566_v51, 1  ;;  %v587_v56 = vrot.slane %v578_v52, 1  ;;  %v577_v57 = vsel %vm263_vm1, 0.0, %v567_v49  ;;  %v607_v60 = vrot.slane %v566_v51, 2 }
 0x468   :  { %v568_v59 = vrot.slane %v559_v53, 7  ;;  %v611_v63 = vrot.slane %v577_v57, 2  ;;  %v589_v0 = vrot.slane %v577_v57, 1  ;;  %v609_v4 = vrot.slane %v578_v52, 2 }
 0x469   :  { %v586_v61 = vsel %vm284_vm2, %v584_v54, %v585_v55  ;;  %v588_v62 = vsel %vm284_vm2, %v585_v55, %v587_v56  ;;  %v608_v16 = vsel %vm307_vm3, %v606_v10, %v607_v60 }
 0x46a   :  { %v1027_v1 = vpack.i.bf16 %v588_v62, %v586_v61  ;;  %v569_v2 = vsel %vm263_vm1, %v567_v49, %v568_v59  ;;  %v579_v3 = vsel %vm263_vm1, %v568_v59, 0.0  ;;  %v610_v17 = vsel %vm307_vm3, %v607_v60, %v609_v4 }
 0x46b   :  { %v612_v5 = vrot.slane %v569_v2, 2  ;;  %v614_v6 = vrot.slane %v579_v3, 2  ;;  %v590_v8 = vrot.slane %v569_v2, 1  ;;  %v592_v9 = vrot.slane %v579_v3, 1 }
 0x46c   :  { %1028 = vrot.lane.b32.xlu0 %v1027_v1, %s1124_s7  ;;  %v1032_v18 = vpack.i.bf16 %v610_v17, %v608_v16 }
 0x46d   :  { %v613_v7 = vsel %vm307_vm3, %v611_v63, %v612_v5  ;;  %v615_v12 = vsel %vm307_vm3, %v612_v5, %v614_v6  ;;  %v591_v13 = vsel %vm284_vm2, %v589_v0, %v590_v8  ;;  %v593_v11 = vsel %vm284_vm2, %v590_v8, %v592_v9  ;;  %v946_v8 = vld [vmem:[%s1388_s6] ss:$0 sm:$0xff]  ;;  %s1126_s6 = smov [#allocation3]  }
 0x46e   :  { %v1037_v14 = vpack.i.bf16 %v615_v12, %v613_v7  ;;  %v1022_v15 = vpack.i.bf16 %v593_v11, %v591_v13  ;;  %s890_s14 = sshll.u32 %s1126_s6, 4  ;;  %s891_s14 = int_to_ptr.vmem [resolvable:$true] %s890_s14 }
 0x46f   :  { %p1107_p1 = scmp.lt.s32.totalorder %s891_s14, %s891_s14 }
 0x470   :  { %1038 = vrot.lane.b32.xlu0 %v1037_v14, %s1125_s15  ;;  %1023 = vrot.lane.b32.xlu1 %v1022_v15, %s1124_s7  ;;  %s1102_s7 = scalar_lea.vmem %s891_s14, 32 }
 0x471   :  { %p1103_p0 = scmp.ne.s32.totalorder %s891_s14, %s1102_s7  ;;  %p1108_p2 = scmp.lt.s32.totalorder %s1102_s7, %s1102_s7 }
 0x473   :  { %p1109_p3 = por %p1108_p2, %p1107_p1 }
 0x474   :  { %1033 = vrot.lane.b32.xlu1 %v1032_v18, %s1125_s15 }
 0x475   :  { %p1110_p4 = pnand %p1109_p3, %p1103_p0 }
 0x4de   :  { %v1029_v19 = vpop.permute.xlu0 %1028 }
 0x4df   :  { %v1031_v24 = vunpack.i.h.bf16 %v1029_v19  ;;  %v1030_v25 = vunpack.i.l.bf16 %v1029_v19 }
 0x4e1   :  { %v628_v37 = vsel %vm183_vm0, %v576_v45, %v1030_v25  ;;  %v629_v39 = vsel %vm183_vm0, %v566_v51, %v1031_v24 }
 0x4e2   :  { %v1024_v20 = vpop.permute.xlu1 %1023  ;;  %v1039_v21 = vpop.permute.xlu0 %1038 }
 0x4e3   :  { %v1026_v22 = vunpack.i.h.bf16 %v1024_v20  ;;  %v1025_v23 = vunpack.i.l.bf16 %v1024_v20  ;;  %v1041_v26 = vunpack.i.h.bf16 %v1039_v21  ;;  %v1040_v27 = vunpack.i.l.bf16 %v1039_v21 }
 0x4e5   :  { %v631_v28 = vsel %vm183_vm0, %v569_v2, %v1026_v22  ;;  %v630_v29 = vsel %vm183_vm0, %v577_v57, %v1025_v23 }
 0x4e6   :  { %v1034_v31 = vpop.permute.xlu1 %1033  ;;  %v635_v35 = vsel %vm334_vm4, %v631_v28, %v1041_v26  ;;  %v634_v36 = vsel %vm334_vm4, %v630_v29, %v1040_v27 }
 0x4e7   :  { %v1036_v33 = vunpack.i.h.bf16 %v1034_v31  ;;  %v1035_v34 = vunpack.i.l.bf16 %v1034_v31  ;;  %v637_v44 = vpack.c.bf16 %v635_v35, %v634_v36 }
 0x4e9   :  { %v632_v40 = vsel %vm334_vm4, %v628_v37, %v1035_v34  ;;  %v633_v41 = vsel %vm334_vm4, %v629_v39, %v1036_v33 }
 0x4ea   :  { %v636_v42 = vpack.c.bf16 %v633_v41, %v632_v40 }
 0x4ec   :  { %992 = vmatprep.mubr.msk.bf16.mxu1 %vm396_vm5, %v636_v42 }
 0x4ed   :  { %993 = vmatmul.mubr.msk.bf16.vlgmr.msra.gmra.mxu1 %vm396_vm5, %v637_v44 }
 0x5ad   :  { %v994_v49 = vpop.f32.mrf.mxu1 }
 0x5ae   :  { %v744_v50 = vadd.f32 %v994_v49, %v933_v47 }
 0x5af   :  { %v735_v52 = vpop.f32.mrf.mxu1 }
 0x5b0   :  { %v944_v45 = vmul.f32 -1.442695, %v744_v50  ;;  %v736_v53 = vadd.f32 %v933_v47, %v735_v52 }
 0x5b1   :  { %v995_v51 = vpop.f32.mrf.mxu1 }
 0x5b2   :  { %1086 = vpow2.f32 %v944_v45  ;;  %v942_v54 = vmul.f32 -1.442695, %v736_v53  ;;  %v747_v55 = vadd.f32 %v995_v51, %v933_v47 }
 0x5b3   :  { %v738_v56 = vpop.f32.mrf.mxu1 }
 0x5b4   :  { %1088 = vpow2.f32 %v942_v54  ;;  %v945_v57 = vmul.f32 -1.442695, %v747_v55  ;;  %v739_v58 = vadd.f32 %v933_v47, %v738_v56 }
 0x5b6   :  { %1090 = vpow2.f32 %v945_v57  ;;  %v943_v59 = vmul.f32 -1.442695, %v739_v58 }
 0x5b8   :  { %1092 = vpow2.f32 %v943_v59 }
 0x5bf   :  { %v1087_v60 = vpop.eup %1086 }
 0x5c0   :  { %v764_v61 = vadd.f32 1.0, %v1087_v60 }
 0x5c1   :  { %v1089_v62 = vpop.eup %1088 }
 0x5c2   :  { %1094 = vrcp.f32 %v764_v61  ;;  %v762_v63 = vadd.f32 1.0, %v1089_v62 }
 0x5c3   :  { %v1091_v0 = vpop.eup %1090 }
 0x5c4   :  { %1096 = vrcp.f32 %v762_v63  ;;  %v765_v1 = vadd.f32 1.0, %v1091_v0 }
 0x5c5   :  { %v1093_v2 = vpop.eup %1092 }
 0x5c6   :  { %1098 = vrcp.f32 %v765_v1  ;;  %v763_v3 = vadd.f32 1.0, %v1093_v2 }
 0x5c8   :  { %1100 = vrcp.f32 %v763_v3 }
 0x5cf   :  { %v1095_v4 = vpop.eup %1094 }
 0x5d0   :  { %v776_v5 = vmul.f32 %v1095_v4, %v744_v50 }
 0x5d1   :  { %v1097_v6 = vpop.eup %1096 }
 0x5d2   :  { %v774_v9 = vmul.f32 %v1097_v6, %v736_v53  ;;  %v780_v10 = vmul.f32 %v776_v5, %v1293_v32 }
 0x5d3   :  { %v1099_v7 = vpop.eup %1098 }
 0x5d4   :  { %v777_v12 = vmul.f32 %v1099_v7, %v747_v55  ;;  %v791_v13 = vmul.f32 %v946_v8, %v780_v10  ;;  %v778_v11 = vmul.f32 %v774_v9, %v1291_v30  ;;  %v947_v30 = vld [vmem:[#allocation2] ss:$0 sm:$0xff] }
 0x5d5   :  { %v1101_v14 = vpop.eup %1100 }
 0x5d6   :  { %v775_v15 = vmul.f32 %v1101_v14, %v739_v58  ;;  %v799_v16 = vsel %vm183_vm0, %v791_v13, 0.0  ;;  %v789_v17 = vmul.f32 %v946_v8, %v778_v11  ;;  %v781_v18 = vmul.f32 %v777_v12, %v1300_v43 }
 0x5d7   :  { %800 = vadd.xlane.f32.xlu0 %v799_v16 }
 0x5d8   :  { %v793_v19 = vsel %vm183_vm0, %v789_v17, 0.0  ;;  %v779_v20 = vmul.f32 %v775_v15, %v1296_v38  ;;  %v792_v21 = vmul.f32 %v946_v8, %v781_v18 }
 0x5d9   :  { %794 = vadd.xlane.f32.xlu1 %v793_v19 }
 0x5da   :  { %v790_v32 = vmul.f32 %v946_v8, %v779_v20  ;;  %v802_v23 = vsel %vm183_vm0, %v792_v21, 0.0 }
 0x5dc   :  { %v796_v22 = vsel %vm183_vm0, %v790_v32, 0.0 }
 0x5dd   :  { %797 = vadd.xlane.f32.xlu0 %v796_v22  ;;  %803 = vadd.xlane.f32.xlu1 %v802_v23 }
 0x660   :  { %v801_v24 = vpop.xlane.xlu0 %800 }
 0x661   :  { %v814_v25 = vadd.f32 %v947_v30, %v801_v24 }
 0x662   :  { %v795_v26 = vpop.xlane.xlu1 %794 }
 0x663   :  { %v812_v27 = vadd.f32 %v947_v30, %v795_v26  ;;  %848 = vxpose.xlu1.b32.start [1/2] (short) (narrow) %v814_v25, 8 }
 0x665   :  { %816 = vxpose.xlu0.b32.start [1/2] (short) (narrow) %v812_v27, 8 }
 0x666   :  { %v798_v43 = vpop.xlane.xlu0 %797  ;;  %v804_v28 = vpop.xlane.xlu1 %803 }
 0x667   :  { %v813_v29 = vadd.f32 %v947_v30, %v798_v43  ;;  %v815_v38 = vadd.f32 %v947_v30, %v804_v28 }
 0x669   :  { %817 = vxpose.xlu0.b32.end [2/2] (short) (narrow) %v813_v29, 8  ;;  %849 = vxpose.xlu1.b32.end [2/2] (short) (narrow) %v815_v38, 8 }
 0x6e1   :  { %v832_v31 = vpop.trf.xlu0  ;;  %v864_v33 = vpop.trf.xlu1 }
 0x6e2   :  { %v880_v34 = vmul.f32 %v832_v31, %v1272_v48  ;;  %v881_v35 = vmul.f32 %v864_v33, %v1266_v46 }
 0x6e4   :  { %883 = vst.msk [vmem:[#allocation3] sm:$0x1] %vm882_vm6, %v880_v34  ;;  %884 = vst.msk [vmem:[#allocation3 + $0x1] sm:$0x1] %vm882_vm6, %v881_v35 }
 0x6e5   :  { %1113 = shalt.err (!%p1110_p4)
}
 0x6e6   :  { %s1127_s15 = smov 16   ;;  %s1128_s16 = smov 1  }
 0x6e7   :  { %896 = dma.vmem_to_hbm [thread:$0]  %s891_s14, 32, %s1390_s8, [#allocation4], %s1127_s15, %s1127_s15, %s1128_s16  }
 0x6e8   :  { %1122 = dma.done.wait [#allocation4], 32  }
 0x6e9   :  { %1123 = vsyncadd [#allocation4], 4294967264 }
 0x6ea   :  { %900 = vsyncpa [#allocation4], 1 }

</bundles_post_ra>
